<compile_context>
chip_gen: v6e
topology: v6e:2x2x1
jax: 0.10.0
libtpu: 0.0.40
codegen_flags: <defaults>
</compile_context>

<pallas_src>
import functools

import jax
import jax.numpy as jnp
from jax.experimental import pallas as pl
from jax.experimental.pallas import tpu as pltpu


# ----------------------------------------------------------------------------
# Pallas kernels
# ----------------------------------------------------------------------------
def _conv12_stats_kernel(x_ref, w1_ref, b1_ref, w2_ref, y2_ref, stats_ref, *,
                         m_actual, tm):
    """conv1 + LeakyReLU + conv2 (no bias) + fused BN partial statistics.

    x_ref : [Cin, TM] bf16     w1_ref : [C1, Cin] bf16   b1_ref : [C1, 1] f32
    w2_ref: [C2, C1]  bf16     y2_ref : [C2, TM]  bf16   stats  : [1, C2, 2] f32
    """
    x = x_ref[...]
    y1 = jnp.dot(w1_ref[...], x, preferred_element_type=jnp.float32)   # [C1,TM]
    y1 = y1 + b1_ref[...]
    y1 = jnp.where(y1 >= 0.0, y1, 0.2 * y1)                            # LeakyReLU
    y2 = jnp.dot(w2_ref[...], y1.astype(w2_ref.dtype),
                 preferred_element_type=jnp.float32)                   # [C2,TM]
    y2_ref[...] = y2.astype(y2_ref.dtype)

    # BN statistics fused into the conv epilogue; mask out padded M columns.
    col = pl.program_id(0) * tm + jax.lax.broadcasted_iota(jnp.int32, (1, tm), 1)
    y2m = jnp.where(col < m_actual, y2, 0.0)
    s = jnp.sum(y2m, axis=1, keepdims=True)                            # [C2,1]
    ss = jnp.sum(y2m * y2m, axis=1, keepdims=True)                     # [C2,1]
    stats_ref[...] = jnp.concatenate([s, ss], axis=1)[None]            # [1,C2,2]


def _bn_lrelu_conv3_kernel(y2_ref, scale_ref, shift_ref, w3_ref, o_ref):
    """BN normalize/affine + LeakyReLU + final 1-channel 1x1 conv (no bias).

    y2_ref: [C2, TM] bf16   scale/shift/w3 : [C2, 1] f32   o_ref: [1, TM] f32
    """
    z = y2_ref[...].astype(jnp.float32) * scale_ref[...] + shift_ref[...]
    z = jnp.where(z >= 0.0, z, 0.2 * z)                                # [C2,TM]
    # 1-output-channel conv = weighted reduction over sublanes (no 1-row MXU op).
    o_ref[...] = jnp.sum(w3_ref[...] * z, axis=0, keepdims=True)       # [1,TM]


# ----------------------------------------------------------------------------
# Forward pass
# ----------------------------------------------------------------------------
def pixel_discriminator_forward(x_nchw, params, *, tm=512):
    """PixelDiscriminator forward.  Input NCHW f32, output NCHW f32 (1 chan)."""
    N, Cin, H, W = x_nchw.shape
    M = N * H * W
    t = (M + tm - 1) // tm
    m_pad = t * tm

    w1, b1 = params["w1"], params["b1"]            # [C1,Cin], [C1]
    w2 = params["w2"]                              # [C2,C1]
    gamma, beta = params["gamma"], params["beta"]  # [C2], [C2]
    w3 = params["w3"]                              # [1,C2]
    C1, C2 = w1.shape[0], w2.shape[0]

    # NCHW -> channel-major [Cin, M]; pad M; bf16 for the MXU.
    x2d = jnp.transpose(x_nchw, (1, 0, 2, 3)).reshape(Cin, M).astype(jnp.float32)
    x2d = jnp.pad(x2d, ((0, 0), (0, m_pad - M))).astype(jnp.bfloat16)

    cparams = pltpu.CompilerParams(dimension_semantics=("parallel",),
                                   vmem_limit_bytes=32 * 1024 * 1024)

    # ---- kernel 1: conv1 + LeakyReLU + conv2 + fused BN partial stats -------
    y2, part_stats = pl.pallas_call(
        functools.partial(_conv12_stats_kernel, m_actual=M, tm=tm),
        out_shape=(jax.ShapeDtypeStruct((C2, m_pad), jnp.bfloat16),
                   jax.ShapeDtypeStruct((t, C2, 2), jnp.float32)),
        grid=(t,),
        in_specs=[
            pl.BlockSpec((Cin, tm), lambda i: (0, i)),
            pl.BlockSpec((C1, Cin), lambda i: (0, 0)),
            pl.BlockSpec((C1, 1), lambda i: (0, 0)),
            pl.BlockSpec((C2, C1), lambda i: (0, 0)),
        ],
        out_specs=(
            pl.BlockSpec((C2, tm), lambda i: (0, i)),
            pl.BlockSpec((1, C2, 2), lambda i: (i, 0, 0)),
        ),
        compiler_params=cparams,
    )(x2d,
      w1.astype(jnp.bfloat16),
      b1.reshape(C1, 1).astype(jnp.float32),
      w2.astype(jnp.bfloat16))

    # ---- finalize BN batch statistics (tiny reduction in plain JAX) ---------
    ssum = jnp.sum(part_stats[:, :, 0], axis=0)
    ssq = jnp.sum(part_stats[:, :, 1], axis=0)
    mean = ssum / M
    var = ssq / M - mean * mean                     # biased, like PyTorch train()
    inv = gamma * jax.lax.rsqrt(var + 1e-5)
    scale = inv.reshape(C2, 1).astype(jnp.float32)
    shift = (beta - mean * inv).reshape(C2, 1).astype(jnp.float32)

    # ---- kernel 2: BN apply + LeakyReLU + final 1-channel conv --------------
    out2d = pl.pallas_call(
        _bn_lrelu_conv3_kernel,
        out_shape=jax.ShapeDtypeStruct((1, m_pad), jnp.float32),
        grid=(t,),
        in_specs=[
            pl.BlockSpec((C2, tm), lambda i: (0, i)),
            pl.BlockSpec((C2, 1), lambda i: (0, 0)),
            pl.BlockSpec((C2, 1), lambda i: (0, 0)),
            pl.BlockSpec((C2, 1), lambda i: (0, 0)),
        ],
        out_specs=pl.BlockSpec((1, tm), lambda i: (0, i)),
        compiler_params=cparams,
    )(y2, scale, shift, w3.reshape(C2, 1).astype(jnp.float32))

    out = out2d[:, :M].reshape(1, N, H, W)
    return jnp.transpose(out, (1, 0, 2, 3))         # [N, 1, H, W]


# ----------------------------------------------------------------------------
# Parameters & pure-JAX reference
# ----------------------------------------------------------------------------
def make_params(key, input_nc, ndf=64):
    """Shapes match PixelDiscriminator(input_nc, ndf, norm_layer=BatchNorm2d)."""
    k1, k2, k3, k4, k5 = jax.random.split(key, 5)
    c1, c2 = ndf, ndf * 2
    return dict(
        w1=0.02 * jax.random.normal(k1, (c1, input_nc), jnp.float32),
        b1=0.02 * jax.random.normal(k2, (c1,), jnp.float32),
        w2=0.02 * jax.random.normal(k3, (c2, c1), jnp.float32),
        gamma=1.0 + 0.02 * jax.random.normal(k4, (c2,), jnp.float32),
        beta=jnp.zeros((c2,), jnp.float32),
        w3=0.02 * jax.random.normal(k5, (1, c2), jnp.float32),
    )


def _reference_forward(x_nchw, params):
    """Pure-JAX f32 reference mirroring the PyTorch module (training-mode BN)."""
    x = x_nchw.astype(jnp.float32)
    y1 = jnp.einsum("oc,nchw->nohw", params["w1"], x) \
        + params["b1"][None, :, None, None]
    y1 = jnp.where(y1 >= 0, y1, 0.2 * y1)
    y2 = jnp.einsum("oc,nchw->nohw", params["w2"], y1)
    mean = jnp.mean(y2, axis=(0, 2, 3))
    var = jnp.mean((y2 - mean[None, :, None, None]) ** 2, axis=(0, 2, 3))
    z = (y2 - mean[None, :, None, None]) * jax.lax.rsqrt(var + 1e-5)
    z = z * params["gamma"][None, :, None, None] + params["beta"][None, :, None, None]
    z = jnp.where(z >= 0, z, 0.2 * z)
    return jnp.einsum("oc,nchw->nohw", params["w3"], z)


# ----------------------------------------------------------------------------
if __name__ == "__main__":
    key = jax.random.PRNGKey(0)
    k_in, k_par = jax.random.split(key)

    # Small config consistent with the module: input_nc=4, ndf=8, spatial=16.
    batch, input_nc, spatial, ndf = 2, 4, 16, 8
    x = jax.random.normal(k_in, (batch, input_nc, spatial, spatial), jnp.float32)
    params = make_params(k_par, input_nc, ndf=ndf)

    # M = 2*16*16 = 512 ; tm=256 -> 2 grid tiles (exercises tiling + megacore).
    out = pixel_discriminator_forward(x, params, tm=256)
    out = jax.block_until_ready(out)

    assert out.shape == (batch, 1, spatial, spatial), out.shape
    assert bool(jnp.all(jnp.isfinite(out)))

    ref = _reference_forward(x, params)
    err = float(jnp.max(jnp.abs(out - ref)))
    assert err < 3e-2, f"max abs error vs reference: {err}"
    print("KERNEL_OK")
</pallas_src>

<mosaic_0001>
module attributes {stable_mosaic.version = 11 : i64} {
  func.func @_conv12_stats_kernel(%arg0: i32, %arg1: memref<4x256xbf16, #tpu.memory_space<vmem>>, %arg2: memref<8x4xbf16, #tpu.memory_space<vmem>>, %arg3: memref<8x1xf32, #tpu.memory_space<vmem>>, %arg4: memref<16x8xbf16, #tpu.memory_space<vmem>>, %arg5: memref<16x256xbf16, #tpu.memory_space<vmem>>, %arg6: memref<1x16x2xf32, #tpu.memory_space<vmem>>) attributes {dimension_semantics = [#tpu.dimension_semantics<parallel>], iteration_bounds = array<i64: 2>, scalar_prefetch = 0 : i64, scratch_operands = 0 : i64, tpu.core_type = #tpu.core_type<tc>, window_params = [{transform_indices = @transform_0, window_bounds = array<i64: 4, 256>}, {pipeline_mode = #tpu.pipeline_mode<synchronous>, transform_indices = @transform_1, window_bounds = array<i64: 8, 4>}, {pipeline_mode = #tpu.pipeline_mode<synchronous>, transform_indices = @transform_2, window_bounds = array<i64: 8, 1>}, {pipeline_mode = #tpu.pipeline_mode<synchronous>, transform_indices = @transform_3, window_bounds = array<i64: 16, 8>}, {transform_indices = @transform_4, window_bounds = array<i64: 16, 256>}, {transform_indices = @transform_5, window_bounds = array<i64: 1, 16, 2>}]} {
    %c0 = arith.constant 0 : index
    %c0_0 = arith.constant 0 : index
    %0 = vector.load %arg1[%c0, %c0_0] : memref<4x256xbf16, #tpu.memory_space<vmem>>, vector<4x256xbf16>
    %c0_1 = arith.constant 0 : index
    %c0_2 = arith.constant 0 : index
    %1 = vector.load %arg2[%c0_1, %c0_2] : memref<8x4xbf16, #tpu.memory_space<vmem>>, vector<8x4xbf16>
    %cst = arith.constant dense<0.000000e+00> : vector<8x256xf32>
    %2 = tpu.matmul %1, %0, %cst {dimension_numbers = #tpu.dot_dimension_numbers<[1], [0], [0], [1], [0, 0, 1, 1], [], []>} : vector<8x4xbf16>, vector<4x256xbf16>, vector<8x256xf32> -> vector<8x256xf32>
    %c0_3 = arith.constant 0 : index
    %c0_4 = arith.constant 0 : index
    %3 = vector.load %arg3[%c0_3, %c0_4] : memref<8x1xf32, #tpu.memory_space<vmem>>, vector<8x1xf32>
    %4 = vector.broadcast %3 : vector<8x1xf32> to vector<8x256xf32>
    %5 = arith.addf %2, %4 : vector<8x256xf32>
    %cst_5 = arith.constant 0.000000e+00 : f32
    %6 = vector.broadcast %cst_5 : f32 to vector<8x256xf32>
    %7 = arith.cmpf oge, %5, %6 : vector<8x256xf32>
    %cst_6 = arith.constant 2.000000e-01 : f32
    %8 = vector.broadcast %cst_6 : f32 to vector<8x256xf32>
    %9 = arith.mulf %8, %5 : vector<8x256xf32>
    %10 = arith.select %7, %5, %9 : vector<8x256xi1>, vector<8x256xf32>
    %c0_7 = arith.constant 0 : index
    %c0_8 = arith.constant 0 : index
    %11 = vector.load %arg4[%c0_7, %c0_8] : memref<16x8xbf16, #tpu.memory_space<vmem>>, vector<16x8xbf16>
    %12 = arith.truncf %10 : vector<8x256xf32> to vector<8x256xbf16>
    %cst_9 = arith.constant dense<0.000000e+00> : vector<16x256xf32>
    %13 = tpu.matmul %11, %12, %cst_9 {dimension_numbers = #tpu.dot_dimension_numbers<[1], [0], [0], [1], [0, 0, 1, 1], [], []>} : vector<16x8xbf16>, vector<8x256xbf16>, vector<16x256xf32> -> vector<16x256xf32>
    %14 = arith.truncf %13 : vector<16x256xf32> to vector<16x256xbf16>
    %c0_10 = arith.constant 0 : index
    %c0_11 = arith.constant 0 : index
    %15 = vector.load %arg5[%c0_10, %c0_11] : memref<16x256xbf16, #tpu.memory_space<vmem>>, vector<16x256xbf16>
    tpu.vector_store %arg5[%c0_10, %c0_11], %14 {strides = array<i32>} : memref<16x256xbf16, #tpu.memory_space<vmem>>, vector<16x256xbf16>,
    %c256_i32 = arith.constant 256 : i32
    %16 = arith.muli %arg0, %c256_i32 : i32
    %17 = tpu.iota {dimensions = array<i32: 1>} : vector<1x256xi32>
    %18 = vector.broadcast %16 : i32 to vector<1x256xi32>
    %19 = arith.addi %18, %17 : vector<1x256xi32>
    %c512_i32 = arith.constant 512 : i32
    %20 = vector.broadcast %c512_i32 : i32 to vector<1x256xi32>
    %21 = arith.cmpi slt, %19, %20 : vector<1x256xi32>
    %cst_12 = arith.constant 0.000000e+00 : f32
    %22 = vector.shape_cast %21 : vector<1x256xi1> to vector<1x256xi1>
    %23 = vector.broadcast %22 : vector<1x256xi1> to vector<16x256xi1>
    %24 = vector.broadcast %cst_12 : f32 to vector<16x256xf32>
    %25 = arith.select %23, %13, %24 : vector<16x256xi1>, vector<16x256xf32>
    %cst_13 = arith.constant dense<0.000000e+00> : vector<16xf32>
    %26 = vector.multi_reduction <add>, %25, %cst_13 [1] : vector<16x256xf32> to vector<16xf32>
    %27 = vector.shape_cast %26 : vector<16xf32> to vector<16x1xf32>
    %28 = arith.mulf %25, %25 : vector<16x256xf32>
    %cst_14 = arith.constant dense<0.000000e+00> : vector<16xf32>
    %29 = vector.multi_reduction <add>, %28, %cst_14 [1] : vector<16x256xf32> to vector<16xf32>
    %30 = vector.shape_cast %29 : vector<16xf32> to vector<16x1xf32>
    %31 = tpu.concatenate %27, %30 in 1 : vector<16x1xf32>, vector<16x1xf32> -> vector<16x2xf32>
    %32 = vector.shape_cast %31 : vector<16x2xf32> to vector<1x16x2xf32>
    %c0_15 = arith.constant 0 : index
    %c0_16 = arith.constant 0 : index
    %c0_17 = arith.constant 0 : index
    %33 = vector.load %arg6[%c0_15, %c0_16, %c0_17] : memref<1x16x2xf32, #tpu.memory_space<vmem>>, vector<1x16x2xf32>
    tpu.vector_store %arg6[%c0_15, %c0_16, %c0_17], %32 {strides = array<i32>} : memref<1x16x2xf32, #tpu.memory_space<vmem>>, vector<1x16x2xf32>,
    return
  }
  func.func @transform_0(%arg0: i32) -> (i32, i32) {
    %c0_i32 = arith.constant 0 : i32
    %c0_i32_0 = arith.constant 0 : i32
    return %c0_i32, %arg0 : i32, i32
  }
  func.func @transform_1(%arg0: i32) -> (i32, i32) {
    %c0_i32 = arith.constant 0 : i32
    %c0_i32_0 = arith.constant 0 : i32
    %c0_i32_1 = arith.constant 0 : i32
    return %c0_i32, %c0_i32_0 : i32, i32
  }
  func.func @transform_2(%arg0: i32) -> (i32, i32) {
    %c0_i32 = arith.constant 0 : i32
    %c0_i32_0 = arith.constant 0 : i32
    %c0_i32_1 = arith.constant 0 : i32
    return %c0_i32, %c0_i32_0 : i32, i32
  }
  func.func @transform_3(%arg0: i32) -> (i32, i32) {
    %c0_i32 = arith.constant 0 : i32
    %c0_i32_0 = arith.constant 0 : i32
    %c0_i32_1 = arith.constant 0 : i32
    return %c0_i32, %c0_i32_0 : i32, i32
  }
  func.func @transform_4(%arg0: i32) -> (i32, i32) {
    %c0_i32 = arith.constant 0 : i32
    %c0_i32_0 = arith.constant 0 : i32
    return %c0_i32, %arg0 : i32, i32
  }
  func.func @transform_5(%arg0: i32) -> (i32, i32, i32) {
    %c0_i32 = arith.constant 0 : i32
    %c0_i32_0 = arith.constant 0 : i32
    %c0_i32_1 = arith.constant 0 : i32
    return %arg0, %c0_i32, %c0_i32_0 : i32, i32, i32
  }
}

</mosaic_0001>

<bundles_post_ra>
// kernel: tpu_custom_call.1
= control target key start
LH: loop header
LB: loop body
LE: loop exit
PB: predicated region body
PF: predicated region fallthrough
CT: control target
= control target key end

     0   :  { %11 = vsyncpa [#allocation3], 0  ;;  %s831_s0 = inlined_call_operand.vmem [shape: bf16[4,512], index: 0, kind: input, shape index: {}]   ;;  %s832_s1 = inlined_call_operand.vmem [shape: bf16[8,4], index: 1, kind: input, shape index: {}]   ;;  %s833_s2 = inlined_call_operand.vmem [shape: f32[8,1], index: 2, kind: input, shape index: {}]   ;;  %s834_s3 = inlined_call_operand.vmem [shape: bf16[16,8], index: 3, kind: input, shape index: {}]   ;;  %s835_s4 = inlined_call_operand.hbm [shape: bf16[16,512], index: 4, kind: output, shape index: {0}]   ;;  %s836_s5 = inlined_call_operand.vmem [shape: f32[2,16,2], index: 5, kind: output, shape index: {1}]  }
   0x1   :  { %13 = vsyncpa [#allocation3 + $0x1], 0  ;;  %s709_s18 = smov 0   ;;  %s711_s19 = smov 0  }
   0x2   :  { %s713_s20 = smov 0   ;;  %s715_s21 = smov 0  }
   0x3 LB: > { %s730_s22 = sadd.s32 4294967295, %s672_s21   ;;  %s540_s23 = sadd.s32 4294967294, %s672_s21   ;;  %s672_s21 = sphi %s715_s21, %s842_s21   ;;  %s668_s20 = sphi %s713_s20, %s841_s20   ;;  %s664_s19 = sphi %s711_s19, %s840_s19   ;;  %s660_s18 = sphi %s709_s18, %s839_s18  }
   0x4   : > { %s734_s24 = sadd.s32 1, %s672_s21   ;;  %s115_s25 = sadd.s32 1, %s668_s20 }
   0x5   : > { %s112_s26 = ssub.s32 %s672_s21, %s734_s24  ;;  %p125_p0 = scmp.ne.s32.totalorder %s668_s20, %s664_s19 }
   0x6   : > { %p113_p1 = scmp.eq.s32.totalorder %s112_s26, 0  ;;  %p126_p2 = scmp.eq.s32.totalorder %s730_s22, 1 }
   0x7   : > { %p131_p3 = scmp.ne.s32.totalorder %s664_s19, %s660_s18  ;;  %p132_p4 = scmp.eq.s32.totalorder %s540_s23, 1 }
   0x8   : > { %s745_s27 = scalar_select %p113_p1, %s668_s20, %s115_s25  }
   0x9   : > { %p747_p5 = por %p126_p2, %p125_p0  ;;  %p751_p6 = por %p132_p4, %p131_p3 }
   0xa   : > { %p543_p7 = scmp.ge.s32.totalorder %s672_s21, 1  ;;  %p194_p8 = scmp.lt.s32.totalorder %s672_s21, 3 }
   0xc   : > { %p195_p9 = pnand %p543_p7, %p194_p8 }
   0xd   : > { %s545_s30 = sshll.u32 (!%p195_p9), %s730_s22, 1  ;;  %s557_s16 = sshll.u32 (!%p195_p9), %s730_s22, 8 }
   0xe   : > { %198 = sbr.rel (%p195_p9) target bundleno = 583 (0x247), region = 36  ;;  %p228_p10 = scmp.lt.s32.totalorder (!%p195_p9), %s545_s30, 3 }
   0xf   : > { %s217_s17 = sand.u32 (!%p195_p9), 1, %s664_s19  }
  0x10   : > { %s544_s23 = sshll.u32 (!%p195_p9), %s217_s17, 4  ;;  %s786_s9 = scalar_lea.sflag (!%p195_p9), [#allocation3], %s217_s17 }
  0x11   : > { %s219_s25 = scalar_lea.vmem (!%p195_p9), [#allocation2], %s544_s23 }
  0x12   : > { %s450_s26 = sshll.u32 (!%p195_p9), %s219_s25, 4  ;;  %s776_s26 = int_to_ptr.vmem [resolvable:$true] %s450_s26 }
  0x13   : > { %v674_v0 = vmov 0   ;;  %v242_v1 = vld [vmem:[%s833_s2] sm:$0xff]  ;;  %s844_s30 = smov (!%p228_p10, %s545_s30), 3  ;;  %vm261_vm0 = vcmask 1041408   ;;  %vm257_vm1 = vcmask 31744   ;;  %vm328_vm4 = vcmask 1043456  }
  0x14   : > { %300 = vmatprep.mubr.bf16.mxu0 %v674_v0  ;;  %610 = vset.pattern.permute.xlu0 %v674_v0  ;;  %s546_s8 = sshll.u32 %s844_s30, 1  ;;  %v241_v5 = vld [vmem:[%s832_s1] sm:$0xf]  ;;  %vm324_vm5 = vcmask 64512   ;;  %v393_v21 = vlaneseq  ;;  %v396_v23 = vstv %s557_s16  ;;  %s566_s30 = sshll.u32 %s730_s22, 7 }
  0x15   : > { %245 = vperm.xlu0 %610, %v242_v1   ;;  %367 = vmatprep.mubr.bf16.mxu1 %v674_v0  ;;  %s231_s11 = scalar_lea.vmem %s831_s0, %s546_s8  ;;  %v611_v20 = vld [vmem:[%s834_s3] sm:$0xff]   ;;  %s782_s8 = scalar_lea.hbm %s835_s4, %s566_s30 }
  0x16   : > { %v549_v2 = vld.sshfl [vmem:[%s231_s11] sm:$0x33 pattern:$0x76325410]  ;;  %v394_v22 = vand.u32 127, %v393_v21  ;;  %s612_s10 = scalar_lea.vmem %s776_s26, 256 }
  0x17   : > { %v256_v3 = vcombine.high %v549_v2, %v549_v2  ;;  %v263_v4 = vsel %vm261_vm0, %v549_v2, 0  ;;  %p613_p11 = scmp.ne.s32.totalorder %s776_s26, %s612_s10  ;;  %s675_s11 = smov [#allocation2]  }
  0x18   : > { %v395_v24 = vadd.s32 128, %v394_v22  ;;  %v397_v25 = vadd.s32 %v396_v23, %v394_v22  ;;  %s616_s12 = sshll.u32 %s675_s11, 4  ;;  %s617_s12 = int_to_ptr.vmem [resolvable:$false] %s616_s12 }
  0x19   : > { %550 = vmatprep.subr.msk.bf16.mxu0 %vm261_vm0, %v256_v3  ;;  %p614_p12 = pnand %p613_p11, %p747_p5  ;;  %s618_s13 = scalar_lea.vmem %s617_s12, 512 }
  0x1a   : > { %283 = vmatpush1.bf16.msra.mxu0 %v263_v4  ;;  %v398_v26 = vadd.s32 %v396_v23, %v395_v24  ;;  %vm399_vm6 = vcmp.lt.s32.totalorder %v397_v25, 512  ;;  %p619_p0 = scmp.lt.s32.totalorder %s776_s26, %s617_s12  ;;  %p620_p1 = scmp.lt.s32.totalorder %s618_s13, %s612_s10 }
  0x1b   : > { %p615_p13 = pneg %p614_p12 }
  0x1c   : > { %vm400_vm7 = vcmp.lt.s32.totalorder %v398_v26, 512  ;;  %p621_p2 = por %p620_p1, %p619_p0 }
  0x1d   : > { %551 = vmatmul.mubr.msk.bf16.vlgmr.msra.gmra.mxu0 %vm257_vm1, %v241_v5 }
  0x1e   : > { %p622_p3 = pnand %p621_p2, %p615_p13 }
  0x90   : > { %v246_v6 = vpop.permute.xlu0 %245 }
  0xdd   : > { %v302_v7 = vpop.f32.mrf.mxu0 }
  0xde   : > { %v303_v8 = vadd.f32 %v302_v7, %v246_v6 }
  0xdf   : > { %v304_v9 = vpop.f32.mrf.mxu0 }
  0xe0   : > { %v311_v10 = vmul.f32 0.2, %v303_v8  ;;  %v305_v11 = vadd.f32 %v304_v9, %v246_v6  ;;  %vm309_vm2 = vcmp.ge.f32.partialorder %v303_v8, 0.0 }
  0xe1   : > { %v306_v12 = vpop.f32.mrf.mxu0 }
  0xe2   : > { %v312_v13 = vmul.f32 0.2, %v305_v11  ;;  %vm310_vm3 = vcmp.ge.f32.partialorder %v305_v11, 0.0  ;;  %v313_v14 = vsel %vm309_vm2, %v303_v8, %v311_v10 }
  0xe3   : > { %v307_v15 = vpop.f32.mrf.mxu0  ;;  %v317_v16 = vpack.c.bf16 %v313_v14, %v313_v14 }
  0xe4   : > { %v314_v17 = vsel %vm310_vm3, %v305_v11, %v312_v13 }
  0xe5   : > { %v318_v18 = vpack.c.bf16 %v314_v17, %v314_v17  ;;  %v330_v19 = vsel %vm328_vm4, %v317_v16, 0 }
  0xe7   : > { %553 = vmatprep.subr.msk.bf16.mxu1 %vm328_vm4, %v318_v18 }
  0xe8   : > { %350 = vmatpush1.bf16.msra.mxu1 %v330_v19 }
  0xeb   : > { %554 = vmatmul.mubr.msk.bf16.vlgmr.msra.gmra.mxu1 %vm324_vm5, %v611_v20 }
 0x1ab   : > { %v369_v27 = vpop.f32.mrf.mxu1 }
 0x1ac   : > { %v405_v28 = vsel %vm399_vm6, %v369_v27, 0.0 }
 0x1ad   : > { %v371_v29 = vpop.f32.mrf.mxu1  ;;  %v415_v34 = vmul.f32 %v405_v28, %v405_v28 }
 0x1ae   : > { %v564_v30 = vpack.c.bf16 %v371_v29, %v369_v27  ;;  %v406_v31 = vsel %vm400_vm7, %v371_v29, 0.0 }
 0x1af   : > { %v373_v32 = vpop.f32.mrf.mxu1  ;;  %v409_v33 = vadd.f32 %v406_v31, %v405_v28  ;;  %v416_v35 = vmul.f32 %v406_v31, %v406_v31 }
 0x1b0   : > { %390 = vst [vmem:[%s219_s25] sm:$0xff] %v564_v30  ;;  %v407_v40 = vsel %vm399_vm6, %v373_v32, 0.0 }
 0x1b1   : > { %410 = vadd.xlane.f32.xlu0 %v409_v33  ;;  %v375_v36 = vpop.f32.mrf.mxu1  ;;  %v419_v37 = vadd.f32 %v416_v35, %v415_v34  ;;  %v417_v43 = vmul.f32 %v407_v40, %v407_v40 }
 0x1b2   : > { %v565_v38 = vpack.c.bf16 %v375_v36, %v373_v32  ;;  %v408_v39 = vsel %vm400_vm7, %v375_v36, 0.0 }
 0x1b3   : > { %420 = vadd.xlane.f32.xlu1 %v419_v37  ;;  %v418_v41 = vmul.f32 %v408_v39, %v408_v39  ;;  %v412_v42 = vadd.f32 %v408_v39, %v407_v40 }
 0x1b4   : > { %391 = vst [vmem:[%s219_s25 + $0x8] sm:$0xff] %v565_v38 }
 0x1b5   : > { %v422_v44 = vadd.f32 %v418_v41, %v417_v43 }
 0x1b7   : > { %413 = vadd.xlane.f32.xlu1 %v412_v42 }
 0x1bb   : > { %423 = vadd.xlane.f32.xlu1 %v422_v44 }
 0x1bc   : > { %625 = shalt.err (!%p622_p3)
}
 0x1bd   : > { %s626_s14 = scalar_lea.hbm %s782_s8, 256  ;;  %s630_s17 = scalar_lea.hbm %s835_s4, 512 }
 0x1be   : > { %p627_p4 = scmp.ne.s32.totalorder %s782_s8, %s626_s14  ;;  %p631_p9 = scmp.lt.s32.totalorder %s782_s8, %s835_s4 }
 0x1bf   : > { %p632_p10 = scmp.lt.s32.totalorder %s630_s17, %s626_s14 }
 0x1c0   : > { %p628_p7 = pnand %p627_p4, %p747_p5 }
 0x1c1   : > { %p633_p11 = por %p632_p10, %p631_p9 }
 0x1c2   : > { %p629_p8 = pneg %p628_p7 }
 0x1c4   : > { %p634_p12 = pnand %p633_p11, %p629_p8 }
 0x1c6   : > { %637 = shalt.err (!%p634_p12)
}
 0x1c7   : > { %s676_s30 = smov 128   ;;  %s677_s6 = smov 256   ;;  %vm425_vm8 = vcmask 7168   ;;  %vm428_vm9 = vcmask 15360  }
 0x1c8   : > { %s678_s7 = smov 8   ;;  %p234_p13 = scmp.lt.s32.totalorder %s730_s22, 1 }
 0x1c9   : > { %567 = dma.vmem_to_hbm [thread:$0]  (%p747_p5), %s776_s26, 256, %s782_s8, %s786_s9, %s676_s30, %s677_s6, %s678_s7  }
 0x1ca   : > { %s846_s22 = smov (!%p234_p13, %s730_s22), 1 }
 0x1cb   : > { %s563_s10 = sshll.u32 %s846_s22, 4 }
 0x1cc   : > { %s238_s13 = scalar_lea.vmem %s836_s5, %s563_s10 }
 0x23a   : > { %v411_v45 = vpop.xlane.xlu0 %410 }
 0x23c   : > { %v421_v46 = vpop.xlane.xlu1 %420 }
 0x23d   : > { %v426_v47 = vsel %vm425_vm8, %v411_v45, %v421_v46 }
 0x23e   : > { %429 = vst.msk [vmem:[%s238_s13] sm:$0xff] %vm428_vm9, %v426_v47 }
 0x240   : > { %v414_v48 = vpop.xlane.xlu1 %413 }
 0x244   : > { %v424_v49 = vpop.xlane.xlu1 %423 }
 0x245   : > { %v427_v50 = vsel %vm425_vm8, %v414_v48, %v424_v49 }
 0x246   : > { %430 = vst.msk [vmem:[%s238_s13 + $0x8] sm:$0xff] %vm428_vm9, %v427_v50 }
 0x247 PF: > { %p573_p5 = scmp.ge.s32.totalorder %s672_s21, 2  ;;  %s468_s22 = sand.u32 1, %s660_s18  }
 0x248   : > { %s469_s28 = scalar_lea.sflag [#allocation3], %s468_s22 }
 0x249   : > { %p570_p0 = pnand %p573_p5, %p751_p6 }
 0x24b   : > { %p571_p1 = pneg %p570_p0 }
 0x24d   : > { %655 = dma.done.wait (%p571_p1), %s469_s28, 256  }
 0x24e   : > { %657 = vsyncadd (%p571_p1), %s469_s28, 4294967040  ;;  %p16_p2 = scmp.ge.s32.totalorder %s734_s24, 4   ;;  %s839_s18 = smov %s664_s19 }
 0x24f   : > { %s840_s19 = smov %s668_s20  ;;  %s841_s20 = smov %s745_s27 }
 0x250   : > { %s842_s21 = smov %s734_s24  ;;  %18 = sbr.rel (!%p16_p2) target bundleno = 3 (0x3), region = 83 }
 0x255   :  { %482 = vsyncpa [#allocation3], 1 }
 0x256   :  { %484 = vsyncpa [#allocation3 + $0x1], 1 }

</bundles_post_ra>
